<compile_context>
chip_gen: v7x
topology: tpu7x:2x2x1
jax: 0.10.0
libtpu: 0.0.40
codegen_flags: <defaults>
</compile_context>

<pallas_src>
import jax
import jax.numpy as jnp
from jax.experimental import pallas as pl
from jax.experimental.pallas import tpu as pltpu


# ----------------------------------------------------------------------------
# Small helpers (tiling / budgets)
# ----------------------------------------------------------------------------
def _round_up(x, m):
    return ((x + m - 1) // m) * m


def _device_kind():
    try:
        return jax.devices()[0].device_kind.lower()
    except Exception:
        return ""


def _vmem_limit_bytes():
    """Generation-aware VMEM budget: ~48 MiB on v7x (64 MiB physical),
    ~100 MiB on v5e/v6e (128 MiB physical)."""
    phys = None
    try:
        phys = int(pltpu.get_tpu_info().vmem_capacity_bytes)
    except Exception:
        phys = None
    if phys is None:
        phys = 64 * 1024 * 1024 if "v7" in _device_kind() else 128 * 1024 * 1024
    return int(max(32 * 1024 * 1024,
                   min(phys - 16 * 1024 * 1024, 100 * 1024 * 1024)))


def _mxu_is_256():
    # v6e / v7x have 2x256^2 bf16 MXUs; v2..v5 are 128^2.
    kind = _device_kind()
    return ("v6" in kind) or ("v7" in kind)


def _lane_round(dim, prefer_256):
    """Round a lane (last-dim) extent up to 128, or to 256 on 256-wide MXUs
    when the extra padding costs <= 12.5%."""
    p128 = _round_up(dim, 128)
    if prefer_256 and dim >= 256:
        p256 = _round_up(dim, 256)
        if (p256 - p128) * 8 <= dim:
            return p256
    return p128


def _choose_hidden_tile(h_p, d_in_p, n_p, wbytes, weight_budget_bytes):
    """Largest multiple-of-128 divisor of h_p whose W1/W2 slices fit the
    per-copy weight budget.  When the full weights fit, returns h_p (fully
    resident, single grid step over H); otherwise H is split over an
    'arbitrary' grid axis (matters mainly on v7x's smaller VMEM)."""
    def wsize(th):
        return (d_in_p * th + th * n_p) * wbytes

    if wsize(h_p) <= weight_budget_bytes:
        return h_p
    best = 128
    th = 128
    while th < h_p:
        if h_p % th == 0 and wsize(th) <= weight_budget_bytes:
            best = th
        th += 128
    return best


def _choose_tm(b, tm_cap):
    """Batch tile: biggest tile that (a) wastes <= 12.5% rows on batch padding
    and (b) gives >= 2 grid steps so the 'parallel' axis can shard across both
    v7x TensorCores; fall back to the smallest (8-row) tile otherwise."""
    cands = [t for t in (1024, 512, 256, 128, 64, 32, 16, 8) if t <= max(tm_cap, 8)]
    for t in cands:
        b_p = _round_up(b, t)
        if (b_p - b) * 8 <= b and b_p // t >= 2:
            return t
    for t in cands:
        b_p = _round_up(b, t)
        if (b_p - b) * 8 <= b:
            return t
    return 8


# ----------------------------------------------------------------------------
# Kernels
# ----------------------------------------------------------------------------
def _mlp_kernel_fused(x_ref, w1_ref, b1_ref, w2_ref, b2_ref, o_ref):
    """Weights fully VMEM-resident: one fused step per batch tile."""
    # layer1 on the MXU (bf16 in, f32 accumulate); bias + ReLU in f32 on the VPU.
    h = jnp.dot(x_ref[...], w1_ref[...], preferred_element_type=jnp.float32)
    h = jnp.maximum(h + b1_ref[...], 0.0)
    # layer2: hidden re-cast to the weight dtype (bf16) for the MXU.
    y = jnp.dot(h.astype(w2_ref.dtype), w2_ref[...],
                preferred_element_type=jnp.float32)
    o_ref[...] = (y + b2_ref[...]).astype(o_ref.dtype)


def _mlp_kernel_hsplit(x_ref, w1_ref, b1_ref, w2_ref, b2_ref, o_ref, acc_ref):
    """Hidden dim split over grid axis 1 ('arbitrary'); f32 accumulator."""
    k = pl.program_id(1)

    @pl.when(k == 0)
    def _init():
        acc_ref[...] = jnp.zeros_like(acc_ref)

    h = jnp.dot(x_ref[...], w1_ref[...], preferred_element_type=jnp.float32)
    h = jnp.maximum(h + b1_ref[...], 0.0)
    acc_ref[...] += jnp.dot(h.astype(w2_ref.dtype), w2_ref[...],
                            preferred_element_type=jnp.float32)

    @pl.when(k == pl.num_programs(1) - 1)
    def _finalize():
        o_ref[...] = (acc_ref[...] + b2_ref[...]).astype(o_ref.dtype)


# ----------------------------------------------------------------------------
# Wrappers
# ----------------------------------------------------------------------------
def prepare_mlp_params(w1, b1, w2, b2, *, compute_dtype=jnp.bfloat16):
    """One-time param prep (do NOT call per forward): lane-dense zero padding
    + cast of the weights to the MXU compute dtype. Biases stay f32 (they are
    added in the f32 epilogue). Zero pads are numerically inert and the output
    pad columns are sliced off in mlp_forward."""
    d_in, h = w1.shape
    d_out = w2.shape[1]
    prefer_256 = (jnp.dtype(compute_dtype) == jnp.dtype(jnp.bfloat16)) and _mxu_is_256()

    d_in_p = _round_up(d_in, 128)          # lane-dense x / clean MXU K feed
    h_p = _lane_round(h, prefer_256)
    n_p = _lane_round(d_out, prefer_256)

    w1_p = jnp.pad(w1.astype(compute_dtype), ((0, d_in_p - d_in), (0, h_p - h)))
    b1_p = jnp.pad(b1.astype(jnp.float32), (0, h_p - h)).reshape(1, h_p)
    w2_p = jnp.pad(w2.astype(compute_dtype), ((0, h_p - h), (0, n_p - d_out)))
    b2_p = jnp.pad(b2.astype(jnp.float32), (0, n_p - d_out)).reshape(1, n_p)

    return {"w1": w1_p, "b1": b1_p, "w2": w2_p, "b2": b2_p,
            "d_in": d_in, "d_out": d_out}


def mlp_forward(x, params, *, tm=1024):
    """Fused MLP forward. x: (B, d_in). params from prepare_mlp_params."""
    w1_p, b1_p, w2_p, b2_p = params["w1"], params["b1"], params["w2"], params["b2"]
    d_in, d_out = params["d_in"], params["d_out"]

    b = x.shape[0]
    assert x.shape[1] == d_in, (x.shape, d_in)
    compute_dtype = w1_p.dtype
    out_dtype = x.dtype

    d_in_p, h_p = w1_p.shape
    n_p = w2_p.shape[1]
    wbytes = jnp.dtype(compute_dtype).itemsize
    obytes = jnp.dtype(out_dtype).itemsize

    vmem_limit = _vmem_limit_bytes()

    # Hidden-dim tiling (large-weight fallback): one copy of the W1/W2 slices
    # must fit ~1/4 of the budget (leaves room for buffering + activations).
    th = _choose_hidden_tile(h_p, d_in_p, n_p, wbytes, vmem_limit // 4)
    n_k = h_p // th

    # Batch tile capped by the remaining VMEM.
    weight_buffers = 1 if n_k == 1 else 2
    resident_bytes = weight_buffers * ((d_in_p * th + th * n_p) * wbytes
                                       + (th + n_p) * 4)
    per_row_bytes = (2 * d_in_p * wbytes        # x tile, double-buffered
                     + 2 * n_p * obytes         # out tile, double-buffered
                     + (th + n_p) * 4)          # f32 hidden + accumulator
    avail = max(vmem_limit - resident_bytes - (2 << 20), 8 * per_row_bytes)
    tm_cap = min(tm, max(8, (avail // per_row_bytes) // 8 * 8))
    tm_sel = _choose_tm(b, tm_cap)
    b_p = _round_up(b, tm_sel)

    # Per-call x prep: cast to the compute dtype and pad only if needed.
    x_c = x if x.dtype == compute_dtype else x.astype(compute_dtype)
    if b_p != b or d_in_p != d_in:
        x_c = jnp.pad(x_c, ((0, b_p - b), (0, d_in_p - d_in)))

    def _wspec(shape, index_map, mode):
        if mode is None:
            return pl.BlockSpec(shape, index_map)
        return pl.BlockSpec(shape, index_map, pipeline_mode=mode)

    def _run(use_single_buffering):
        res_mode = pl.Buffered(1) if use_single_buffering else None
        if n_k == 1:
            # Fully resident weights; 1-D grid over batch tiles.
            return pl.pallas_call(
                _mlp_kernel_fused,
                out_shape=jax.ShapeDtypeStruct((b_p, n_p), out_dtype),
                grid=(b_p // tm_sel,),
                in_specs=[
                    pl.BlockSpec((tm_sel, d_in_p), lambda i: (i, 0)),
                    _wspec((d_in_p, h_p), lambda i: (0, 0), res_mode),
                    _wspec((1, h_p), lambda i: (0, 0), res_mode),
                    _wspec((h_p, n_p), lambda i: (0, 0), res_mode),
                    _wspec((1, n_p), lambda i: (0, 0), res_mode),
                ],
                out_specs=pl.BlockSpec((tm_sel, n_p), lambda i: (i, 0)),
                compiler_params=pltpu.CompilerParams(
                    dimension_semantics=("parallel",),
                    vmem_limit_bytes=vmem_limit,
                ),
            )(x_c, w1_p, b1_p, w2_p, b2_p)
        else:
            # Hidden dim split over a trailing 'arbitrary' axis; W1/W2 slices
            # stream (double-buffered), f32 accumulator carries partial y.
            return pl.pallas_call(
                _mlp_kernel_hsplit,
                out_shape=jax.ShapeDtypeStruct((b_p, n_p), out_dtype),
                grid=(b_p // tm_sel, n_k),
                in_specs=[
                    pl.BlockSpec((tm_sel, d_in_p), lambda i, k: (i, 0)),
                    pl.BlockSpec((d_in_p, th), lambda i, k: (0, k)),
                    pl.BlockSpec((1, th), lambda i, k: (0, k)),
                    pl.BlockSpec((th, n_p), lambda i, k: (k, 0)),
                    _wspec((1, n_p), lambda i, k: (0, 0), res_mode),
                ],
                out_specs=pl.BlockSpec((tm_sel, n_p), lambda i, k: (i, 0)),
                scratch_shapes=[pltpu.VMEM((tm_sel, n_p), jnp.float32)],
                compiler_params=pltpu.CompilerParams(
                    dimension_semantics=("parallel", "arbitrary"),
                    vmem_limit_bytes=vmem_limit,
                ),
            )(x_c, w1_p, b1_p, w2_p, b2_p)

    # pl.Buffered(1) on the constant-index (resident) operands is a pure
    # VMEM-footprint optimization; fall back to default double-buffering if
    # this jax/libtpu build rejects it.
    try:
        out_p = _run(True)
    except Exception:
        out_p = _run(False)

    # Slice off batch / lane padding outside the kernel.
    return out_p[:b, :d_out]


def my_mlp(x, w1, b1, w2, b2, *, compute_dtype=jnp.bfloat16, tm=1024):
    """Convenience one-shot wrapper (prep + forward). Prefer calling
    prepare_mlp_params once and reusing it across forwards."""
    return mlp_forward(x, prepare_mlp_params(w1, b1, w2, b2,
                                             compute_dtype=compute_dtype), tm=tm)


# ----------------------------------------------------------------------------
# Self-test
# ----------------------------------------------------------------------------
if __name__ == "__main__":
    # Small shapes consistent with the module: batch=8, input=32, hidden=64, out=16.
    B, D_IN, H, D_OUT = 8, 32, 64, 16

    key = jax.random.PRNGKey(0)
    kx, kw1, kb1, kw2, kb2 = jax.random.split(key, 5)

    x = jax.random.normal(kx, (B, D_IN), dtype=jnp.float32)
    # Deterministic param init (uniform like PyTorch's default fan_in scheme).
    bound1 = 1.0 / (D_IN ** 0.5)
    w1 = jax.random.uniform(kw1, (D_IN, H), minval=-bound1, maxval=bound1,
                            dtype=jnp.float32)
    b1 = jax.random.uniform(kb1, (H,), minval=-bound1, maxval=bound1,
                            dtype=jnp.float32)
    bound2 = 1.0 / (H ** 0.5)
    w2 = jax.random.uniform(kw2, (H, D_OUT), minval=-bound2, maxval=bound2,
                            dtype=jnp.float32)
    b2 = jax.random.uniform(kb2, (D_OUT,), minval=-bound2, maxval=bound2,
                            dtype=jnp.float32)

    # One-time prep (pad + bf16 cast), then the per-call forward.
    params = prepare_mlp_params(w1, b1, w2, b2)
    out = mlp_forward(x, params)
    out = jax.block_until_ready(out)
    assert out.shape == (B, D_OUT)

    # Tight check vs. a pure-JAX reference using the same bf16/f32 pipeline.
    xc = x.astype(jnp.bfloat16)
    w1c = w1.astype(jnp.bfloat16)
    w2c = w2.astype(jnp.bfloat16)
    h_ref = jnp.maximum(jnp.dot(xc, w1c, preferred_element_type=jnp.float32) + b1, 0.0)
    ref_bf16 = jnp.dot(h_ref.astype(jnp.bfloat16), w2c,
                       preferred_element_type=jnp.float32) + b2
    assert jnp.allclose(out, ref_bf16, atol=1e-3, rtol=1e-3), \
        float(jnp.max(jnp.abs(out - ref_bf16)))

    # Loose sanity check vs. the full-f32 reference (eval mode: dropout = identity).
    ref_f32 = jnp.maximum(x @ w1 + b1, 0.0) @ w2 + b2
    assert jnp.allclose(out, ref_f32, atol=5e-2, rtol=5e-2), \
        float(jnp.max(jnp.abs(out - ref_f32)))

    print("KERNEL_OK")
</pallas_src>

<mosaic_0001>
module attributes {stable_mosaic.version = 11 : i64} {
  func.func @_mlp_kernel_fused(%arg0: i32, %arg1: memref<8x128xbf16, #tpu.memory_space<vmem>>, %arg2: memref<128x128xbf16, #tpu.memory_space<vmem>>, %arg3: memref<1x128xf32, #tpu.memory_space<vmem>>, %arg4: memref<128x128xbf16, #tpu.memory_space<vmem>>, %arg5: memref<1x128xf32, #tpu.memory_space<vmem>>, %arg6: memref<8x128xf32, #tpu.memory_space<vmem>>) attributes {dimension_semantics = [#tpu.dimension_semantics<parallel>], iteration_bounds = array<i64: 1>, scalar_prefetch = 0 : i64, scratch_operands = 0 : i64, tpu.core_type = #tpu.core_type<tc>, window_params = [{transform_indices = @transform_0, window_bounds = array<i64: 8, 128>}, {pipeline_mode = #tpu.pipeline_mode<synchronous>, transform_indices = @transform_1, window_bounds = array<i64: 128, 128>}, {pipeline_mode = #tpu.pipeline_mode<synchronous>, transform_indices = @transform_2, window_bounds = array<i64: 1, 128>}, {pipeline_mode = #tpu.pipeline_mode<synchronous>, transform_indices = @transform_3, window_bounds = array<i64: 128, 128>}, {pipeline_mode = #tpu.pipeline_mode<synchronous>, transform_indices = @transform_4, window_bounds = array<i64: 1, 128>}, {transform_indices = @transform_5, window_bounds = array<i64: 8, 128>}]} {
    %c0 = arith.constant 0 : index
    %c0_0 = arith.constant 0 : index
    %0 = vector.load %arg1[%c0, %c0_0] : memref<8x128xbf16, #tpu.memory_space<vmem>>, vector<8x128xbf16>
    %c0_1 = arith.constant 0 : index
    %c0_2 = arith.constant 0 : index
    %1 = vector.load %arg2[%c0_1, %c0_2] : memref<128x128xbf16, #tpu.memory_space<vmem>>, vector<128x128xbf16>
    %cst = arith.constant dense<0.000000e+00> : vector<8x128xf32>
    %2 = tpu.matmul %0, %1, %cst {dimension_numbers = #tpu.dot_dimension_numbers<[1], [0], [0], [1], [0, 0, 1, 1], [], []>} : vector<8x128xbf16>, vector<128x128xbf16>, vector<8x128xf32> -> vector<8x128xf32>
    %c0_3 = arith.constant 0 : index
    %c0_4 = arith.constant 0 : index
    %3 = vector.load %arg3[%c0_3, %c0_4] : memref<1x128xf32, #tpu.memory_space<vmem>>, vector<1x128xf32>
    %4 = vector.broadcast %3 : vector<1x128xf32> to vector<8x128xf32>
    %5 = arith.addf %2, %4 : vector<8x128xf32>
    %cst_5 = arith.constant 0.000000e+00 : f32
    %6 = vector.broadcast %cst_5 : f32 to vector<8x128xf32>
    %7 = arith.maximumf %5, %6 : vector<8x128xf32>
    %8 = arith.truncf %7 : vector<8x128xf32> to vector<8x128xbf16>
    %c0_6 = arith.constant 0 : index
    %c0_7 = arith.constant 0 : index
    %9 = vector.load %arg4[%c0_6, %c0_7] : memref<128x128xbf16, #tpu.memory_space<vmem>>, vector<128x128xbf16>
    %cst_8 = arith.constant dense<0.000000e+00> : vector<8x128xf32>
    %10 = tpu.matmul %8, %9, %cst_8 {dimension_numbers = #tpu.dot_dimension_numbers<[1], [0], [0], [1], [0, 0, 1, 1], [], []>} : vector<8x128xbf16>, vector<128x128xbf16>, vector<8x128xf32> -> vector<8x128xf32>
    %c0_9 = arith.constant 0 : index
    %c0_10 = arith.constant 0 : index
    %11 = vector.load %arg5[%c0_9, %c0_10] : memref<1x128xf32, #tpu.memory_space<vmem>>, vector<1x128xf32>
    %12 = vector.broadcast %11 : vector<1x128xf32> to vector<8x128xf32>
    %13 = arith.addf %10, %12 : vector<8x128xf32>
    %c0_11 = arith.constant 0 : index
    %c0_12 = arith.constant 0 : index
    %14 = vector.load %arg6[%c0_11, %c0_12] : memref<8x128xf32, #tpu.memory_space<vmem>>, vector<8x128xf32>
    tpu.vector_store %arg6[%c0_11, %c0_12], %13 {strides = array<i32>} : memref<8x128xf32, #tpu.memory_space<vmem>>, vector<8x128xf32>,
    return
  }
  func.func @transform_0(%arg0: i32) -> (i32, i32) {
    %c0_i32 = arith.constant 0 : i32
    %c0_i32_0 = arith.constant 0 : i32
    return %arg0, %c0_i32 : i32, i32
  }
  func.func @transform_1(%arg0: i32) -> (i32, i32) {
    %c0_i32 = arith.constant 0 : i32
    %c0_i32_0 = arith.constant 0 : i32
    %c0_i32_1 = arith.constant 0 : i32
    return %c0_i32, %c0_i32_0 : i32, i32
  }
  func.func @transform_2(%arg0: i32) -> (i32, i32) {
    %c0_i32 = arith.constant 0 : i32
    %c0_i32_0 = arith.constant 0 : i32
    %c0_i32_1 = arith.constant 0 : i32
    return %c0_i32, %c0_i32_0 : i32, i32
  }
  func.func @transform_3(%arg0: i32) -> (i32, i32) {
    %c0_i32 = arith.constant 0 : i32
    %c0_i32_0 = arith.constant 0 : i32
    %c0_i32_1 = arith.constant 0 : i32
    return %c0_i32, %c0_i32_0 : i32, i32
  }
  func.func @transform_4(%arg0: i32) -> (i32, i32) {
    %c0_i32 = arith.constant 0 : i32
    %c0_i32_0 = arith.constant 0 : i32
    %c0_i32_1 = arith.constant 0 : i32
    return %c0_i32, %c0_i32_0 : i32, i32
  }
  func.func @transform_5(%arg0: i32) -> (i32, i32) {
    %c0_i32 = arith.constant 0 : i32
    %c0_i32_0 = arith.constant 0 : i32
    return %arg0, %c0_i32 : i32, i32
  }
}

module attributes {stable_mosaic.version = 11 : i64} {
  func.func @_mlp_kernel_fused(%arg0: i32, %arg1: memref<8x128xbf16, #tpu.memory_space<vmem>>, %arg2: memref<128x128xbf16, #tpu.memory_space<vmem>>, %arg3: memref<1x128xf32, #tpu.memory_space<vmem>>, %arg4: memref<128x128xbf16, #tpu.memory_space<vmem>>, %arg5: memref<1x128xf32, #tpu.memory_space<vmem>>, %arg6: memref<8x128xf32, #tpu.memory_space<vmem>>) attributes {dimension_semantics = [#tpu.dimension_semantics<parallel>], iteration_bounds = array<i64: 1>, scalar_prefetch = 0 : i64, scratch_operands = 0 : i64, tpu.core_type = #tpu.core_type<tc>, window_params = [{transform_indices = @transform_0, window_bounds = array<i64: 8, 128>}, {pipeline_mode = #tpu.pipeline_mode<synchronous>, transform_indices = @transform_1, window_bounds = array<i64: 128, 128>}, {pipeline_mode = #tpu.pipeline_mode<synchronous>, transform_indices = @transform_2, window_bounds = array<i64: 1, 128>}, {pipeline_mode = #tpu.pipeline_mode<synchronous>, transform_indices = @transform_3, window_bounds = array<i64: 128, 128>}, {pipeline_mode = #tpu.pipeline_mode<synchronous>, transform_indices = @transform_4, window_bounds = array<i64: 1, 128>}, {transform_indices = @transform_5, window_bounds = array<i64: 8, 128>}]} {
    %c0 = arith.constant 0 : index
    %c0_0 = arith.constant 0 : index
    %0 = vector.load %arg1[%c0, %c0_0] : memref<8x128xbf16, #tpu.memory_space<vmem>>, vector<8x128xbf16>
    %c0_1 = arith.constant 0 : index
    %c0_2 = arith.constant 0 : index
    %1 = vector.load %arg2[%c0_1, %c0_2] : memref<128x128xbf16, #tpu.memory_space<vmem>>, vector<128x128xbf16>
    %cst = arith.constant dense<0.000000e+00> : vector<8x128xf32>
    %2 = tpu.matmul %0, %1, %cst {dimension_numbers = #tpu.dot_dimension_numbers<[1], [0], [0], [1], [0, 0, 1, 1], [], []>} : vector<8x128xbf16>, vector<128x128xbf16>, vector<8x128xf32> -> vector<8x128xf32>
    %c0_3 = arith.constant 0 : index
    %c0_4 = arith.constant 0 : index
    %3 = vector.load %arg3[%c0_3, %c0_4] : memref<1x128xf32, #tpu.memory_space<vmem>>, vector<1x128xf32>
    %4 = vector.broadcast %3 : vector<1x128xf32> to vector<8x128xf32>
    %5 = arith.addf %2, %4 : vector<8x128xf32>
    %cst_5 = arith.constant 0.000000e+00 : f32
    %6 = vector.broadcast %cst_5 : f32 to vector<8x128xf32>
    %7 = arith.maximumf %5, %6 : vector<8x128xf32>
    %8 = arith.truncf %7 : vector<8x128xf32> to vector<8x128xbf16>
    %c0_6 = arith.constant 0 : index
    %c0_7 = arith.constant 0 : index
    %9 = vector.load %arg4[%c0_6, %c0_7] : memref<128x128xbf16, #tpu.memory_space<vmem>>, vector<128x128xbf16>
    %cst_8 = arith.constant dense<0.000000e+00> : vector<8x128xf32>
    %10 = tpu.matmul %8, %9, %cst_8 {dimension_numbers = #tpu.dot_dimension_numbers<[1], [0], [0], [1], [0, 0, 1, 1], [], []>} : vector<8x128xbf16>, vector<128x128xbf16>, vector<8x128xf32> -> vector<8x128xf32>
    %c0_9 = arith.constant 0 : index
    %c0_10 = arith.constant 0 : index
    %11 = vector.load %arg5[%c0_9, %c0_10] : memref<1x128xf32, #tpu.memory_space<vmem>>, vector<1x128xf32>
    %12 = vector.broadcast %11 : vector<1x128xf32> to vector<8x128xf32>
    %13 = arith.addf %10, %12 : vector<8x128xf32>
    %c0_11 = arith.constant 0 : index
    %c0_12 = arith.constant 0 : index
    %14 = vector.load %arg6[%c0_11, %c0_12] : memref<8x128xf32, #tpu.memory_space<vmem>>, vector<8x128xf32>
    tpu.vector_store %arg6[%c0_11, %c0_12], %13 {strides = array<i32>} : memref<8x128xf32, #tpu.memory_space<vmem>>, vector<8x128xf32>,
    return
  }
  func.func @transform_0(%arg0: i32) -> (i32, i32) {
    %c0_i32 = arith.constant 0 : i32
    %c0_i32_0 = arith.constant 0 : i32
    return %arg0, %c0_i32 : i32, i32
  }
  func.func @transform_1(%arg0: i32) -> (i32, i32) {
    %c0_i32 = arith.constant 0 : i32
    %c0_i32_0 = arith.constant 0 : i32
    %c0_i32_1 = arith.constant 0 : i32
    return %c0_i32, %c0_i32_0 : i32, i32
  }
  func.func @transform_2(%arg0: i32) -> (i32, i32) {
    %c0_i32 = arith.constant 0 : i32
    %c0_i32_0 = arith.constant 0 : i32
    %c0_i32_1 = arith.constant 0 : i32
    return %c0_i32, %c0_i32_0 : i32, i32
  }
  func.func @transform_3(%arg0: i32) -> (i32, i32) {
    %c0_i32 = arith.constant 0 : i32
    %c0_i32_0 = arith.constant 0 : i32
    %c0_i32_1 = arith.constant 0 : i32
    return %c0_i32, %c0_i32_0 : i32, i32
  }
  func.func @transform_4(%arg0: i32) -> (i32, i32) {
    %c0_i32 = arith.constant 0 : i32
    %c0_i32_0 = arith.constant 0 : i32
    %c0_i32_1 = arith.constant 0 : i32
    return %c0_i32, %c0_i32_0 : i32, i32
  }
  func.func @transform_5(%arg0: i32) -> (i32, i32) {
    %c0_i32 = arith.constant 0 : i32
    %c0_i32_0 = arith.constant 0 : i32
    return %arg0, %c0_i32 : i32, i32
  }
}

</mosaic_0001>

<bundles_post_ra>
// kernel: tpu_custom_call.1
= control target key start
LH: loop header
LB: loop body
LE: loop exit
PB: predicated region body
PF: predicated region fallthrough
CT: control target
= control target key end

     0   :  { %10 = vsyncpa [#allocation3], 0  ;;  %s681_s0 = inlined_call_operand.hbm [shape: bf16[8,128], index: 0, kind: input, shape index: {}]   ;;  %s682_s1 = inlined_call_operand.hbm [shape: bf16[128,128], index: 1, kind: input, shape index: {}]   ;;  %s683_s2 = inlined_call_operand.hbm [shape: f32[1,128], index: 2, kind: input, shape index: {}]   ;;  %s684_s3 = inlined_call_operand.hbm [shape: bf16[128,128], index: 3, kind: input, shape index: {}]   ;;  %s685_s4 = inlined_call_operand.hbm [shape: f32[1,128], index: 4, kind: input, shape index: {}]   ;;  %s686_s5 = inlined_call_operand.hbm [shape: f32[8,128], index: 5, kind: output, shape index: {}]  }
   0x1   :  { %11 = vsyncpa [#allocation6], 0 }
   0x2   :  { %12 = vsyncpa [#allocation9], 0 }
   0x3   :  { %13 = vsyncpa [#allocation4], 0  ;;  %s569_s18 = smov [#allocation5]   ;;  %s429_s22 = scalar_lea.hbm %s682_s1, 1024 }
   0x4   :  { %s29_s19 = sshll.u32 %s569_s18, 4  ;;  %p430_p0 = scmp.ne.s32.totalorder %s682_s1, %s429_s22  ;;  %s30_s19 = int_to_ptr.vmem [resolvable:$true] %s29_s19 }
   0x5   :  { %p433_p1 = scmp.lt.u32.totalorder %s429_s22, %s682_s1 }
   0x7   :  { %p435_p2 = pnand %p433_p1, %p430_p0 }
   0x9   :  { %438 = shalt.err (!%p435_p2)
}
   0xa   :  { %s439_s27 = scalar_lea.vmem %s30_s19, 1024  ;;  %p444_p4 = scmp.lt.s32.totalorder %s30_s19, %s30_s19 }
   0xb   :  { %p440_p3 = scmp.ne.s32.totalorder %s30_s19, %s439_s27  ;;  %p445_p5 = scmp.lt.s32.totalorder %s439_s27, %s439_s27 }
   0xd   :  { %p446_p6 = por %p445_p5, %p444_p4 }
   0xf   :  { %p447_p7 = pnand %p446_p6, %p440_p3 }
  0x11   :  { %450 = shalt.err (!%p447_p7)
}
  0x12   :  { %s570_s28 = smov 64   ;;  %s571_s29 = smov 4  }
  0x13   :  { %35 = dma.hbm_to_vmem [thread:$0]  %s682_s1, 1024, %s30_s19, [#allocation6], %s570_s28, %s570_s28, %s571_s29  }
  0x14   :  { %s572_s7 = smov [#allocation8]   ;;  %s573_s9 = smov [#allocation2]  }
  0x15   :  { %s51_s8 = sshll.u32 %s572_s7, 4  ;;  %s20_s10 = sshll.u32 %s573_s9, 4  ;;  %s52_s8 = int_to_ptr.vmem [resolvable:$true] %s51_s8  ;;  %s21_s10 = int_to_ptr.vmem [resolvable:$true] %s20_s10 }
  0x16   :  { %s451_s13 = scalar_lea.hbm %s684_s3, 1024 }
  0x17   :  { %p452_p8 = scmp.ne.s32.totalorder %s684_s3, %s451_s13  ;;  %p455_p9 = scmp.lt.u32.totalorder %s451_s13, %s684_s3 }
  0x19   :  { %p457_p10 = pnand %p455_p9, %p452_p8 }
  0x1b   :  { %460 = shalt.err (!%p457_p10)
}
  0x1c   :  { %s461_s1 = scalar_lea.vmem %s52_s8, 1024  ;;  %p466_p12 = scmp.lt.s32.totalorder %s52_s8, %s52_s8 }
  0x1d   :  { %p462_p11 = scmp.ne.s32.totalorder %s52_s8, %s461_s1  ;;  %p467_p13 = scmp.lt.s32.totalorder %s461_s1, %s461_s1 }
  0x1f   :  { %p468_p0 = por %p467_p13, %p466_p12 }
  0x21   :  { %p469_p1 = pnand %p468_p0, %p462_p11 }
  0x23   :  { %472 = shalt.err (!%p469_p1)
}
  0x24   :  { %57 = dma.hbm_to_vmem [thread:$0]  %s684_s3, 1024, %s52_s8, [#allocation9], %s570_s28, %s570_s28, %s571_s29  }
  0x25   :  { %s473_s22 = scalar_lea.hbm %s681_s0, 64 }
  0x26   :  { %p474_p2 = scmp.ne.s32.totalorder %s681_s0, %s473_s22  ;;  %p477_p3 = scmp.lt.u32.totalorder %s473_s22, %s681_s0 }
  0x28   :  { %p479_p4 = pnand %p477_p3, %p474_p2 }
  0x2a   :  { %482 = shalt.err (!%p479_p4)
}
  0x2b   :  { %s483_s27 = scalar_lea.vmem %s21_s10, 64  ;;  %p488_p6 = scmp.lt.s32.totalorder %s21_s10, %s21_s10 }
  0x2c   :  { %p484_p5 = scmp.ne.s32.totalorder %s21_s10, %s483_s27  ;;  %p489_p7 = scmp.lt.s32.totalorder %s483_s27, %s483_s27 }
  0x2e   :  { %p490_p8 = por %p489_p7, %p488_p6 }
  0x30   :  { %p491_p9 = pnand %p490_p8, %p484_p5 }
  0x32   :  { %494 = shalt.err (!%p491_p9)
}
  0x33   :  { %23 = dma.hbm_to_vmem [thread:$0]  %s681_s0, 64, %s21_s10, [#allocation3]  }
  0x34   :  { %s574_s29 = smov [#allocation7]   ;;  %s575_s6 = smov [#allocation10]  }
  0x35   :  { %s42_s30 = sshll.u32 %s574_s29, 4  ;;  %s64_s7 = sshll.u32 %s575_s6, 4  ;;  %s43_s30 = int_to_ptr.vmem [resolvable:$true] %s42_s30  ;;  %s65_s7 = int_to_ptr.vmem [resolvable:$true] %s64_s7 }
  0x36   :  { %s495_s11 = scalar_lea.hbm %s683_s2, 16 }
  0x37   :  { %p496_p10 = scmp.ne.s32.totalorder %s683_s2, %s495_s11  ;;  %p499_p11 = scmp.lt.u32.totalorder %s495_s11, %s683_s2 }
  0x39   :  { %p501_p12 = pnand %p499_p11, %p496_p10 }
  0x3b   :  { %504 = shalt.err (!%p501_p12)
}
  0x3c   :  { %s505_s0 = scalar_lea.vmem %s43_s30, 16  ;;  %s509_s10 = scalar_lea.vmem %s43_s30, 32 }
  0x3d   :  { %p506_p13 = scmp.ne.s32.totalorder %s43_s30, %s505_s0  ;;  %p510_p0 = scmp.lt.s32.totalorder %s43_s30, %s43_s30 }
  0x3e   :  { %p511_p1 = scmp.lt.s32.totalorder %s509_s10, %s505_s0 }
  0x40   :  { %p512_p2 = por %p511_p1, %p510_p0 }
  0x42   :  { %p513_p3 = pnand %p512_p2, %p506_p13 }
  0x44   :  { %516 = shalt.err (!%p513_p3)
}
  0x45   :  { %45 = dma.hbm_to_vmem [thread:$0]  %s683_s2, 16, %s43_s30, [#allocation6]  }
  0x46   :  { %s517_s19 = scalar_lea.hbm %s685_s4, 16 }
  0x47   :  { %p518_p4 = scmp.ne.s32.totalorder %s685_s4, %s517_s19  ;;  %p521_p5 = scmp.lt.u32.totalorder %s517_s19, %s685_s4 }
  0x49   :  { %p523_p6 = pnand %p521_p5, %p518_p4 }
  0x4b   :  { %526 = shalt.err (!%p523_p6)
}
  0x4c   :  { %s527_s24 = scalar_lea.vmem %s65_s7, 16  ;;  %s531_s25 = scalar_lea.vmem %s65_s7, 32 }
  0x4d   :  { %p528_p7 = scmp.ne.s32.totalorder %s65_s7, %s527_s24  ;;  %p532_p8 = scmp.lt.s32.totalorder %s65_s7, %s65_s7 }
  0x4e   :  { %p533_p9 = scmp.lt.s32.totalorder %s531_s25, %s527_s24 }
  0x50   :  { %p534_p10 = por %p533_p9, %p532_p8 }
  0x52   :  { %p535_p11 = pnand %p534_p10, %p528_p7 }
  0x54   :  { %538 = shalt.err (!%p535_p11)
}
  0x55   :  { %67 = dma.hbm_to_vmem [thread:$0]  %s685_s4, 16, %s65_s7, [#allocation9]  }
  0x56   :  { %561 = dma.done.wait [#allocation3], 64  }
  0x57   :  { %562 = vsyncadd [#allocation3], 4294967232 }
  0x58   :  { %563 = dma.done.wait [#allocation6], 1040  }
  0x59   :  { %564 = vsyncadd [#allocation6], 4294966256 }
  0x5a   :  { %565 = dma.done.wait [#allocation9], 1040  }
  0x5b   :  { %566 = vsyncadd [#allocation9], 4294966256  ;;  %v576_v0 = vmov 0.0   ;;  %vm577_vm0 = vmmov 0   ;;  %v413_v1 = vld [vmem:[#allocation5] sm:$0xff]   ;;  %v414_v2 = vld [vmem:[#allocation5 + $0x8] sm:$0xff]  }
  0x5c   :  { %363 = vmatprep.subr.bf16.mxu0 %v576_v0  ;;  %379 = vmatprep.mubr.msk.bf16.mxu0 %vm577_vm0, %v576_v0  ;;  %v415_v3 = vld [vmem:[#allocation5 + $0x10] sm:$0xff]   ;;  %v421_v4 = vld [vmem:[#allocation8] sm:$0xff]   ;;  %v416_v5 = vld [vmem:[#allocation5 + $0x18] sm:$0xff]   ;;  %s578_s4 = smov [#allocation11]  }
  0x5d   :  { %383 = vmatprep.subr.bf16.mxu1 %v576_v0  ;;  %399 = vmatprep.mubr.msk.bf16.mxu1 %vm577_vm0, %v576_v0  ;;  %v422_v6 = vld [vmem:[#allocation8 + $0x8] sm:$0xff]   ;;  %v417_v7 = vld [vmem:[#allocation5 + $0x20] sm:$0xff]   ;;  %v423_v8 = vld [vmem:[#allocation8 + $0x10] sm:$0xff]   ;;  %s316_s27 = sshll.u32 %s578_s4, 4  ;;  %s317_s27 = int_to_ptr.vmem [resolvable:$true] %s316_s27 }
  0x5e   :  { %364 = vmatpush3.bf16.msra.mxu0 %v413_v1  ;;  %384 = vmatpush3.bf16.msra.mxu1 %v421_v4  ;;  %v418_v9 = vld [vmem:[#allocation5 + $0x28] sm:$0xff]   ;;  %v424_v10 = vld [vmem:[#allocation8 + $0x18] sm:$0xff]   ;;  %v419_v11 = vld [vmem:[#allocation5 + $0x30] sm:$0xff]   ;;  %s539_s3 = scalar_lea.vmem %s317_s27, 128  ;;  %p544_p13 = scmp.lt.s32.totalorder %s317_s27, %s317_s27 }
  0x5f   :  { %365 = vmatprep.subr.bf16.mxu0 %v576_v0  ;;  %385 = vmatprep.subr.bf16.mxu1 %v576_v0  ;;  %v425_v12 = vld [vmem:[#allocation8 + $0x20] sm:$0xff]   ;;  %v420_v13 = vld [vmem:[#allocation5 + $0x38] sm:$0xff]   ;;  %v426_v14 = vld [vmem:[#allocation8 + $0x28] sm:$0xff]   ;;  %p540_p12 = scmp.ne.s32.totalorder %s317_s27, %s539_s3  ;;  %p545_p0 = scmp.lt.s32.totalorder %s539_s3, %s539_s3 }
  0x60   :  { %v84_v15 = vld [vmem:[#allocation2] sm:$0xf]  ;;  %v427_v16 = vld [vmem:[#allocation8 + $0x30] sm:$0xff]   ;;  %v327_v18 = vld [vmem:[#allocation7] ss:$0 sm:$0xff] }
  0x61   :  { %v428_v17 = vld [vmem:[#allocation8 + $0x38] sm:$0xff]   ;;  %v336_v26 = vld [vmem:[#allocation10] ss:$0 sm:$0xff]  ;;  %p546_p1 = por %p545_p0, %p544_p13 }
  0x62   :  { %366 = vmatpush3.bf16.msra.mxu0 %v414_v2  ;;  %386 = vmatpush3.bf16.msra.mxu1 %v422_v6 }
  0x63   :  { %367 = vmatprep.subr.bf16.mxu0 %v576_v0  ;;  %387 = vmatprep.subr.bf16.mxu1 %v576_v0  ;;  %p547_p2 = pnand %p546_p1, %p540_p12 }
  0x66   :  { %368 = vmatpush3.bf16.msra.mxu0 %v415_v3  ;;  %388 = vmatpush3.bf16.msra.mxu1 %v423_v8 }
  0x67   :  { %369 = vmatprep.subr.bf16.mxu0 %v576_v0  ;;  %389 = vmatprep.subr.bf16.mxu1 %v576_v0 }
  0x6a   :  { %370 = vmatpush3.bf16.msra.mxu0 %v416_v5  ;;  %390 = vmatpush3.bf16.msra.mxu1 %v424_v10 }
  0x6b   :  { %371 = vmatprep.subr.bf16.mxu0 %v576_v0  ;;  %391 = vmatprep.subr.bf16.mxu1 %v576_v0 }
  0x6e   :  { %372 = vmatpush3.bf16.msra.mxu0 %v417_v7  ;;  %392 = vmatpush3.bf16.msra.mxu1 %v425_v12 }
  0x6f   :  { %373 = vmatprep.subr.bf16.mxu0 %v576_v0  ;;  %393 = vmatprep.subr.bf16.mxu1 %v576_v0 }
  0x72   :  { %374 = vmatpush3.bf16.msra.mxu0 %v418_v9  ;;  %394 = vmatpush3.bf16.msra.mxu1 %v426_v14 }
  0x73   :  { %375 = vmatprep.subr.bf16.mxu0 %v576_v0  ;;  %395 = vmatprep.subr.bf16.mxu1 %v576_v0 }
  0x76   :  { %376 = vmatpush3.bf16.msra.mxu0 %v419_v11  ;;  %396 = vmatpush3.bf16.msra.mxu1 %v427_v16 }
  0x77   :  { %377 = vmatprep.subr.bf16.mxu0 %v576_v0  ;;  %397 = vmatprep.subr.bf16.mxu1 %v576_v0 }
  0x7a   :  { %378 = vmatpush3.bf16.msra.mxu0 %v420_v13  ;;  %398 = vmatpush3.bf16.msra.mxu1 %v428_v17 }
  0x7d   :  { %380 = vmatmul.mubr.bf16.vlgmr.msra.gmra.mrb[0].mxu0 %v84_v15 }
 0x150   :  { %v190_v19 = vpop.f32.mrb[0].mxu0 }
 0x151   :  { %v191_v20 = vadd.f32 %v327_v18, %v190_v19  ;;  %v381_v21 = vpop.f32.mrb[1].mxu0 }
 0x152   :  { %v193_v22 = vpop.f32.mrb[2].mxu0 }
 0x153   :  { %v196_v23 = vmax.f32 %v191_v20, 0.0  ;;  %v382_v24 = vpop.f32.mrb[3].mxu0 }
 0x155   :  { %v197_v25 = vpack.c.bf16 %v196_v23, %v196_v23 }
 0x157   :  { %400 = vmatmul.mubr.bf16.vlgmr.msra.gmra.mrb[0].mxu1 %v197_v25 }
 0x22a   :  { %v303_v27 = vpop.f32.mrb[0].mxu1 }
 0x22b   :  { %v304_v28 = vadd.f32 %v336_v26, %v303_v27  ;;  %v401_v29 = vpop.f32.mrb[1].mxu1 }
 0x22c   :  { %v306_v30 = vpop.f32.mrb[2].mxu1 }
 0x22d   :  { %309 = vst [vmem:[#allocation11] sm:$0xff] %v304_v28  ;;  %v402_v31 = vpop.f32.mrb[3].mxu1 }
 0x22e   :  { %550 = shalt.err (!%p547_p2)
}
 0x22f   :  { %s551_s30 = scalar_lea.hbm %s686_s5, 128 }
 0x230   :  { %p552_p3 = scmp.ne.s32.totalorder %s686_s5, %s551_s30  ;;  %p555_p4 = scmp.lt.u32.totalorder %s551_s30, %s686_s5 }
 0x232   :  { %p557_p5 = pnand %p555_p4, %p552_p3 }
 0x234   :  { %560 = shalt.err (!%p557_p5)
}
 0x235   :  { %319 = dma.vmem_to_hbm [thread:$0]  %s317_s27, 128, %s686_s5, [#allocation4]  }
 0x236   :  { %567 = dma.done.wait [#allocation4], 128  }
 0x237   :  { %568 = vsyncadd [#allocation4], 4294967168 }
 0x238   :  { %323 = vsyncpa [#allocation3], 1 }
 0x239   :  { %324 = vsyncpa [#allocation6], 1 }
 0x23a   :  { %325 = vsyncpa [#allocation9], 1 }
 0x23b   :  { %326 = vsyncpa [#allocation4], 1 }

// kernel: tpu_custom_call.1
= control target key start
LH: loop header
LB: loop body
LE: loop exit
PB: predicated region body
PF: predicated region fallthrough
CT: control target
= control target key end

     0   :  { %10 = vsyncpa [#allocation3], 0  ;;  %s681_s0 = inlined_call_operand.hbm [shape: bf16[8,128], index: 0, kind: input, shape index: {}]   ;;  %s682_s1 = inlined_call_operand.hbm [shape: bf16[128,128], index: 1, kind: input, shape index: {}]   ;;  %s683_s2 = inlined_call_operand.hbm [shape: f32[1,128], index: 2, kind: input, shape index: {}]   ;;  %s684_s3 = inlined_call_operand.hbm [shape: bf16[128,128], index: 3, kind: input, shape index: {}]   ;;  %s685_s4 = inlined_call_operand.hbm [shape: f32[1,128], index: 4, kind: input, shape index: {}]   ;;  %s686_s5 = inlined_call_operand.hbm [shape: f32[8,128], index: 5, kind: output, shape index: {}]  }
   0x1   :  { %11 = vsyncpa [#allocation6], 0 }
   0x2   :  { %12 = vsyncpa [#allocation9], 0 }
   0x3   :  { %13 = vsyncpa [#allocation4], 0  ;;  %s569_s18 = smov [#allocation5]   ;;  %s429_s22 = scalar_lea.hbm %s682_s1, 1024 }
   0x4   :  { %s29_s19 = sshll.u32 %s569_s18, 4  ;;  %p430_p0 = scmp.ne.s32.totalorder %s682_s1, %s429_s22  ;;  %s30_s19 = int_to_ptr.vmem [resolvable:$true] %s29_s19 }
   0x5   :  { %p433_p1 = scmp.lt.u32.totalorder %s429_s22, %s682_s1 }
   0x7   :  { %p435_p2 = pnand %p433_p1, %p430_p0 }
   0x9   :  { %438 = shalt.err (!%p435_p2)
}
   0xa   :  { %s439_s27 = scalar_lea.vmem %s30_s19, 1024  ;;  %p444_p4 = scmp.lt.s32.totalorder %s30_s19, %s30_s19 }
   0xb   :  { %p440_p3 = scmp.ne.s32.totalorder %s30_s19, %s439_s27  ;;  %p445_p5 = scmp.lt.s32.totalorder %s439_s27, %s439_s27 }
   0xd   :  { %p446_p6 = por %p445_p5, %p444_p4 }
   0xf   :  { %p447_p7 = pnand %p446_p6, %p440_p3 }
  0x11   :  { %450 = shalt.err (!%p447_p7)
}
  0x12   :  { %s570_s28 = smov 64   ;;  %s571_s29 = smov 4  }
  0x13   :  { %35 = dma.hbm_to_vmem [thread:$0]  %s682_s1, 1024, %s30_s19, [#allocation6], %s570_s28, %s570_s28, %s571_s29  }
  0x14   :  { %s572_s7 = smov [#allocation8]   ;;  %s573_s9 = smov [#allocation2]  }
  0x15   :  { %s51_s8 = sshll.u32 %s572_s7, 4  ;;  %s20_s10 = sshll.u32 %s573_s9, 4  ;;  %s52_s8 = int_to_ptr.vmem [resolvable:$true] %s51_s8  ;;  %s21_s10 = int_to_ptr.vmem [resolvable:$true] %s20_s10 }
  0x16   :  { %s451_s13 = scalar_lea.hbm %s684_s3, 1024 }
  0x17   :  { %p452_p8 = scmp.ne.s32.totalorder %s684_s3, %s451_s13  ;;  %p455_p9 = scmp.lt.u32.totalorder %s451_s13, %s684_s3 }
  0x19   :  { %p457_p10 = pnand %p455_p9, %p452_p8 }
  0x1b   :  { %460 = shalt.err (!%p457_p10)
}
  0x1c   :  { %s461_s1 = scalar_lea.vmem %s52_s8, 1024  ;;  %p466_p12 = scmp.lt.s32.totalorder %s52_s8, %s52_s8 }
  0x1d   :  { %p462_p11 = scmp.ne.s32.totalorder %s52_s8, %s461_s1  ;;  %p467_p13 = scmp.lt.s32.totalorder %s461_s1, %s461_s1 }
  0x1f   :  { %p468_p0 = por %p467_p13, %p466_p12 }
  0x21   :  { %p469_p1 = pnand %p468_p0, %p462_p11 }
  0x23   :  { %472 = shalt.err (!%p469_p1)
}
  0x24   :  { %57 = dma.hbm_to_vmem [thread:$0]  %s684_s3, 1024, %s52_s8, [#allocation9], %s570_s28, %s570_s28, %s571_s29  }
  0x25   :  { %s473_s22 = scalar_lea.hbm %s681_s0, 64 }
  0x26   :  { %p474_p2 = scmp.ne.s32.totalorder %s681_s0, %s473_s22  ;;  %p477_p3 = scmp.lt.u32.totalorder %s473_s22, %s681_s0 }
  0x28   :  { %p479_p4 = pnand %p477_p3, %p474_p2 }
  0x2a   :  { %482 = shalt.err (!%p479_p4)
}
  0x2b   :  { %s483_s27 = scalar_lea.vmem %s21_s10, 64  ;;  %p488_p6 = scmp.lt.s32.totalorder %s21_s10, %s21_s10 }
  0x2c   :  { %p484_p5 = scmp.ne.s32.totalorder %s21_s10, %s483_s27  ;;  %p489_p7 = scmp.lt.s32.totalorder %s483_s27, %s483_s27 }
  0x2e   :  { %p490_p8 = por %p489_p7, %p488_p6 }
  0x30   :  { %p491_p9 = pnand %p490_p8, %p484_p5 }
  0x32   :  { %494 = shalt.err (!%p491_p9)
}
  0x33   :  { %23 = dma.hbm_to_vmem [thread:$0]  %s681_s0, 64, %s21_s10, [#allocation3]  }
  0x34   :  { %s574_s29 = smov [#allocation7]   ;;  %s575_s6 = smov [#allocation10]  }
  0x35   :  { %s42_s30 = sshll.u32 %s574_s29, 4  ;;  %s64_s7 = sshll.u32 %s575_s6, 4  ;;  %s43_s30 = int_to_ptr.vmem [resolvable:$true] %s42_s30  ;;  %s65_s7 = int_to_ptr.vmem [resolvable:$true] %s64_s7 }
  0x36   :  { %s495_s11 = scalar_lea.hbm %s683_s2, 16 }
  0x37   :  { %p496_p10 = scmp.ne.s32.totalorder %s683_s2, %s495_s11  ;;  %p499_p11 = scmp.lt.u32.totalorder %s495_s11, %s683_s2 }
  0x39   :  { %p501_p12 = pnand %p499_p11, %p496_p10 }
  0x3b   :  { %504 = shalt.err (!%p501_p12)
}
  0x3c   :  { %s505_s0 = scalar_lea.vmem %s43_s30, 16  ;;  %s509_s10 = scalar_lea.vmem %s43_s30, 32 }
  0x3d   :  { %p506_p13 = scmp.ne.s32.totalorder %s43_s30, %s505_s0  ;;  %p510_p0 = scmp.lt.s32.totalorder %s43_s30, %s43_s30 }
  0x3e   :  { %p511_p1 = scmp.lt.s32.totalorder %s509_s10, %s505_s0 }
  0x40   :  { %p512_p2 = por %p511_p1, %p510_p0 }
  0x42   :  { %p513_p3 = pnand %p512_p2, %p506_p13 }
  0x44   :  { %516 = shalt.err (!%p513_p3)
}
  0x45   :  { %45 = dma.hbm_to_vmem [thread:$0]  %s683_s2, 16, %s43_s30, [#allocation6]  }
  0x46   :  { %s517_s19 = scalar_lea.hbm %s685_s4, 16 }
  0x47   :  { %p518_p4 = scmp.ne.s32.totalorder %s685_s4, %s517_s19  ;;  %p521_p5 = scmp.lt.u32.totalorder %s517_s19, %s685_s4 }
  0x49   :  { %p523_p6 = pnand %p521_p5, %p518_p4 }
  0x4b   :  { %526 = shalt.err (!%p523_p6)
}
  0x4c   :  { %s527_s24 = scalar_lea.vmem %s65_s7, 16  ;;  %s531_s25 = scalar_lea.vmem %s65_s7, 32 }
  0x4d   :  { %p528_p7 = scmp.ne.s32.totalorder %s65_s7, %s527_s24  ;;  %p532_p8 = scmp.lt.s32.totalorder %s65_s7, %s65_s7 }
  0x4e   :  { %p533_p9 = scmp.lt.s32.totalorder %s531_s25, %s527_s24 }
  0x50   :  { %p534_p10 = por %p533_p9, %p532_p8 }
  0x52   :  { %p535_p11 = pnand %p534_p10, %p528_p7 }
  0x54   :  { %538 = shalt.err (!%p535_p11)
}
  0x55   :  { %67 = dma.hbm_to_vmem [thread:$0]  %s685_s4, 16, %s65_s7, [#allocation9]  }
  0x56   :  { %561 = dma.done.wait [#allocation3], 64  }
  0x57   :  { %562 = vsyncadd [#allocation3], 4294967232 }
  0x58   :  { %563 = dma.done.wait [#allocation6], 1040  }
  0x59   :  { %564 = vsyncadd [#allocation6], 4294966256 }
  0x5a   :  { %565 = dma.done.wait [#allocation9], 1040  }
  0x5b   :  { %566 = vsyncadd [#allocation9], 4294966256  ;;  %v576_v0 = vmov 0.0   ;;  %vm577_vm0 = vmmov 0   ;;  %v413_v1 = vld [vmem:[#allocation5] sm:$0xff]   ;;  %v414_v2 = vld [vmem:[#allocation5 + $0x8] sm:$0xff]  }
  0x5c   :  { %363 = vmatprep.subr.bf16.mxu0 %v576_v0  ;;  %379 = vmatprep.mubr.msk.bf16.mxu0 %vm577_vm0, %v576_v0  ;;  %v415_v3 = vld [vmem:[#allocation5 + $0x10] sm:$0xff]   ;;  %v421_v4 = vld [vmem:[#allocation8] sm:$0xff]   ;;  %v416_v5 = vld [vmem:[#allocation5 + $0x18] sm:$0xff]   ;;  %s578_s4 = smov [#allocation11]  }
  0x5d   :  { %383 = vmatprep.subr.bf16.mxu1 %v576_v0  ;;  %399 = vmatprep.mubr.msk.bf16.mxu1 %vm577_vm0, %v576_v0  ;;  %v422_v6 = vld [vmem:[#allocation8 + $0x8] sm:$0xff]   ;;  %v417_v7 = vld [vmem:[#allocation5 + $0x20] sm:$0xff]   ;;  %v423_v8 = vld [vmem:[#allocation8 + $0x10] sm:$0xff]   ;;  %s316_s27 = sshll.u32 %s578_s4, 4  ;;  %s317_s27 = int_to_ptr.vmem [resolvable:$true] %s316_s27 }
  0x5e   :  { %364 = vmatpush3.bf16.msra.mxu0 %v413_v1  ;;  %384 = vmatpush3.bf16.msra.mxu1 %v421_v4  ;;  %v418_v9 = vld [vmem:[#allocation5 + $0x28] sm:$0xff]   ;;  %v424_v10 = vld [vmem:[#allocation8 + $0x18] sm:$0xff]   ;;  %v419_v11 = vld [vmem:[#allocation5 + $0x30] sm:$0xff]   ;;  %s539_s3 = scalar_lea.vmem %s317_s27, 128  ;;  %p544_p13 = scmp.lt.s32.totalorder %s317_s27, %s317_s27 }
  0x5f   :  { %365 = vmatprep.subr.bf16.mxu0 %v576_v0  ;;  %385 = vmatprep.subr.bf16.mxu1 %v576_v0  ;;  %v425_v12 = vld [vmem:[#allocation8 + $0x20] sm:$0xff]   ;;  %v420_v13 = vld [vmem:[#allocation5 + $0x38] sm:$0xff]   ;;  %v426_v14 = vld [vmem:[#allocation8 + $0x28] sm:$0xff]   ;;  %p540_p12 = scmp.ne.s32.totalorder %s317_s27, %s539_s3  ;;  %p545_p0 = scmp.lt.s32.totalorder %s539_s3, %s539_s3 }
  0x60   :  { %v84_v15 = vld [vmem:[#allocation2] sm:$0xf]  ;;  %v427_v16 = vld [vmem:[#allocation8 + $0x30] sm:$0xff]   ;;  %v327_v18 = vld [vmem:[#allocation7] ss:$0 sm:$0xff] }
  0x61   :  { %v428_v17 = vld [vmem:[#allocation8 + $0x38] sm:$0xff]   ;;  %v336_v26 = vld [vmem:[#allocation10] ss:$0 sm:$0xff]  ;;  %p546_p1 = por %p545_p0, %p544_p13 }
  0x62   :  { %366 = vmatpush3.bf16.msra.mxu0 %v414_v2  ;;  %386 = vmatpush3.bf16.msra.mxu1 %v422_v6 }
  0x63   :  { %367 = vmatprep.subr.bf16.mxu0 %v576_v0  ;;  %387 = vmatprep.subr.bf16.mxu1 %v576_v0  ;;  %p547_p2 = pnand %p546_p1, %p540_p12 }
  0x66   :  { %368 = vmatpush3.bf16.msra.mxu0 %v415_v3  ;;  %388 = vmatpush3.bf16.msra.mxu1 %v423_v8 }
  0x67   :  { %369 = vmatprep.subr.bf16.mxu0 %v576_v0  ;;  %389 = vmatprep.subr.bf16.mxu1 %v576_v0 }
  0x6a   :  { %370 = vmatpush3.bf16.msra.mxu0 %v416_v5  ;;  %390 = vmatpush3.bf16.msra.mxu1 %v424_v10 }
  0x6b   :  { %371 = vmatprep.subr.bf16.mxu0 %v576_v0  ;;  %391 = vmatprep.subr.bf16.mxu1 %v576_v0 }
  0x6e   :  { %372 = vmatpush3.bf16.msra.mxu0 %v417_v7  ;;  %392 = vmatpush3.bf16.msra.mxu1 %v425_v12 }
  0x6f   :  { %373 = vmatprep.subr.bf16.mxu0 %v576_v0  ;;  %393 = vmatprep.subr.bf16.mxu1 %v576_v0 }
  0x72   :  { %374 = vmatpush3.bf16.msra.mxu0 %v418_v9  ;;  %394 = vmatpush3.bf16.msra.mxu1 %v426_v14 }
  0x73   :  { %375 = vmatprep.subr.bf16.mxu0 %v576_v0  ;;  %395 = vmatprep.subr.bf16.mxu1 %v576_v0 }
  0x76   :  { %376 = vmatpush3.bf16.msra.mxu0 %v419_v11  ;;  %396 = vmatpush3.bf16.msra.mxu1 %v427_v16 }
  0x77   :  { %377 = vmatprep.subr.bf16.mxu0 %v576_v0  ;;  %397 = vmatprep.subr.bf16.mxu1 %v576_v0 }
  0x7a   :  { %378 = vmatpush3.bf16.msra.mxu0 %v420_v13  ;;  %398 = vmatpush3.bf16.msra.mxu1 %v428_v17 }
  0x7d   :  { %380 = vmatmul.mubr.bf16.vlgmr.msra.gmra.mrb[0].mxu0 %v84_v15 }
 0x150   :  { %v190_v19 = vpop.f32.mrb[0].mxu0 }
 0x151   :  { %v191_v20 = vadd.f32 %v327_v18, %v190_v19  ;;  %v381_v21 = vpop.f32.mrb[1].mxu0 }
 0x152   :  { %v193_v22 = vpop.f32.mrb[2].mxu0 }
 0x153   :  { %v196_v23 = vmax.f32 %v191_v20, 0.0  ;;  %v382_v24 = vpop.f32.mrb[3].mxu0 }
 0x155   :  { %v197_v25 = vpack.c.bf16 %v196_v23, %v196_v23 }
 0x157   :  { %400 = vmatmul.mubr.bf16.vlgmr.msra.gmra.mrb[0].mxu1 %v197_v25 }
 0x22a   :  { %v303_v27 = vpop.f32.mrb[0].mxu1 }
 0x22b   :  { %v304_v28 = vadd.f32 %v336_v26, %v303_v27  ;;  %v401_v29 = vpop.f32.mrb[1].mxu1 }
 0x22c   :  { %v306_v30 = vpop.f32.mrb[2].mxu1 }
 0x22d   :  { %309 = vst [vmem:[#allocation11] sm:$0xff] %v304_v28  ;;  %v402_v31 = vpop.f32.mrb[3].mxu1 }
 0x22e   :  { %550 = shalt.err (!%p547_p2)
}
 0x22f   :  { %s551_s30 = scalar_lea.hbm %s686_s5, 128 }
 0x230   :  { %p552_p3 = scmp.ne.s32.totalorder %s686_s5, %s551_s30  ;;  %p555_p4 = scmp.lt.u32.totalorder %s551_s30, %s686_s5 }
 0x232   :  { %p557_p5 = pnand %p555_p4, %p552_p3 }
 0x234   :  { %560 = shalt.err (!%p557_p5)
}
 0x235   :  { %319 = dma.vmem_to_hbm [thread:$0]  %s317_s27, 128, %s686_s5, [#allocation4]  }
 0x236   :  { %567 = dma.done.wait [#allocation4], 128  }
 0x237   :  { %568 = vsyncadd [#allocation4], 4294967168 }
 0x238   :  { %323 = vsyncpa [#allocation3], 1 }
 0x239   :  { %324 = vsyncpa [#allocation6], 1 }
 0x23a   :  { %325 = vsyncpa [#allocation9], 1 }
 0x23b   :  { %326 = vsyncpa [#allocation4], 1 }

</bundles_post_ra>
